<compile_context>
chip_gen: v7x
topology: tpu7x:2x2x1
jax: 0.10.0
libtpu: 0.0.40
codegen_flags: <defaults>
</compile_context>

<pallas_src>
import jax
import jax.numpy as jnp
from jax.experimental import pallas as pl
from jax.experimental.pallas import tpu as pltpu

LANE = 128                          # output channels padded to a multiple of this
TILE = 512                          # row / reduction tile for the streaming aggregation
SMALL_N_MAX = 512                   # graphs up to this many nodes use the fused path
H_RESIDENT_BYTES = 8 * 1024 * 1024  # keep whole H VMEM-resident under this (x2 buffers)
VMEM_LIMIT = 48 * 1024 * 1024       # safe on v5e/v6e (128 MiB) and v7x (64 MiB)


def _round_up(x, m):
    return (x + m - 1) // m * m


# ------------------------------ Pallas kernels ------------------------------ #
def _fused_gcn_kernel(adj_ref, x_ref, w_ref, dinv_ref, b_ref, o_ref):
    """Single-block fused path (small graphs): everything resident in VMEM, f32."""
    h = jnp.dot(x_ref[...], w_ref[...], preferred_element_type=jnp.float32)
    h = h * dinv_ref[...]                                   # fold dinv_j (source)
    agg = jnp.dot(adj_ref[...], h, preferred_element_type=jnp.float32)
    o_ref[...] = jnp.maximum(agg * dinv_ref[...] + b_ref[...], 0.0).astype(o_ref.dtype)


def _make_agg_kernel(h_resident, tk):
    """acc(i) += A_raw[i,k] @ H'[k]; dinv_i * acc + bias, ReLU in the epilogue."""

    def kernel(adj_ref, h_ref, dinv_ref, b_ref, o_ref, acc_ref):
        k = pl.program_id(1)

        @pl.when(k == 0)
        def _():
            acc_ref[...] = jnp.zeros_like(acc_ref)

        if h_resident:
            # H is fully VMEM-resident; slice the current k-tile in place.
            h_blk = h_ref[pl.ds(pl.multiple_of(k * tk, tk), tk), :]
        else:
            h_blk = h_ref[...]

        acc_ref[...] += jnp.dot(adj_ref[...], h_blk,
                                preferred_element_type=jnp.float32)

        @pl.when(k == pl.num_programs(1) - 1)
        def _():
            o_ref[...] = jnp.maximum(
                acc_ref[...] * dinv_ref[...] + b_ref[...], 0.0
            ).astype(o_ref.dtype)

    return kernel


# -------------------------------- wrappers ---------------------------------- #
def _aggregate(adj_p, h_p, dinv_p, b_p, *, tm, tk):
    """adj_p: [Np,Np] bf16 raw adjacency, h_p: [Np,Cp] bf16, dinv_p: [Np,1] f32."""
    n_p, c_out_p = h_p.shape
    h_resident = h_p.size * h_p.dtype.itemsize <= H_RESIDENT_BYTES
    if h_resident:
        h_spec = pl.BlockSpec((n_p, c_out_p), lambda i, k: (0, 0))   # resident
    else:
        h_spec = pl.BlockSpec((tk, c_out_p), lambda i, k: (k, 0))    # streamed

    return pl.pallas_call(
        _make_agg_kernel(h_resident, tk),
        out_shape=jax.ShapeDtypeStruct((n_p, c_out_p), jnp.float32),
        grid_spec=pltpu.PrefetchScalarGridSpec(
            num_scalar_prefetch=0,
            grid=(n_p // tm, n_p // tk),
            in_specs=[
                pl.BlockSpec((tm, tk), lambda i, k: (i, k)),         # A_raw tile
                h_spec,                                              # H'
                pl.BlockSpec((tm, 1), lambda i, k: (i, 0)),          # dinv rows
                pl.BlockSpec((1, c_out_p), lambda i, k: (0, 0)),     # bias
            ],
            out_specs=pl.BlockSpec((tm, c_out_p), lambda i, k: (i, 0)),
            scratch_shapes=[pltpu.VMEM((tm, c_out_p), jnp.float32)],
        ),
        compiler_params=pltpu.CompilerParams(
            dimension_semantics=("parallel", "arbitrary"),
            vmem_limit_bytes=VMEM_LIMIT,
        ),
    )(adj_p, h_p, dinv_p, b_p)


def gcn_layer_pallas(x, edge_index, weight, bias):
    """GCNConv(improved=True) + ReLU.

    x: [N, C_in] f32, edge_index: [2, E] int32, weight: [C_in, C_out] f32,
    bias: [C_out] f32.  Returns [N, C_out] f32.
    """
    n, c_in = x.shape
    c_out = weight.shape[1]
    c_out_p = _round_up(c_out, LANE)

    fused = n <= SMALL_N_MAX
    if fused:
        tm = tk = None
        n_p = _round_up(n, LANE)
        adj_dtype = jnp.float32                 # tiny working set -> keep exact f32
    else:
        tm = tk = TILE
        n_p = _round_up(n, TILE)
        adj_dtype = jnp.bfloat16                # raw {0,1,2} entries -> exact in bf16

    # Build the raw adjacency (incl. weight-2 self-loops) ONCE, directly at padded
    # size and in the streaming dtype.  Normalization is folded out (see kernels),
    # so the streamed matrix stays exactly representable.
    # Note: A[i, j] counts edges j->i (PyG gcn_norm in-degree convention).
    row, col = edge_index[0], edge_index[1]
    adj_p = jnp.zeros((n_p, n_p), adj_dtype)
    adj_p = adj_p.at[col, row].add(jnp.ones(row.shape[0], adj_dtype))
    diag = jnp.arange(n)
    adj_p = adj_p.at[diag, diag].add(jnp.asarray(2.0, adj_dtype))

    deg = adj_p.sum(axis=1, dtype=jnp.float32)                   # exact (small ints)
    dinv_p = jnp.where(deg > 0.0, jax.lax.rsqrt(deg), 0.0)[:, None]  # [Np, 1] f32

    x_p = jnp.zeros((n_p, c_in), jnp.float32).at[:n, :].set(x.astype(jnp.float32))
    w_p = jnp.zeros((c_in, c_out_p), jnp.float32).at[:, :c_out].set(
        weight.astype(jnp.float32))
    b_p = jnp.zeros((1, c_out_p), jnp.float32).at[0, :c_out].set(
        bias.astype(jnp.float32).reshape(-1))

    if fused:
        out_p = pl.pallas_call(
            _fused_gcn_kernel,
            out_shape=jax.ShapeDtypeStruct((n_p, c_out_p), jnp.float32),
        )(adj_p, x_p, w_p, dinv_p, b_p)
    else:
        # Feature transform: tiny C_in/C_out -> plain XLA dot (negligible vs A@H),
        # with the source-node D^-1/2 folded in; streamed to the kernel as bf16.
        h_p = ((x_p @ w_p) * dinv_p).astype(jnp.bfloat16)
        out_p = _aggregate(adj_p, h_p, dinv_p, b_p, tm=tm, tk=tk)

    return out_p[:n, :c_out]


# ------------------------------ pure-JAX reference --------------------------- #
def gcn_layer_reference(x, edge_index, weight, bias):
    n = x.shape[0]
    row, col = edge_index[0], edge_index[1]
    A = jnp.zeros((n, n), jnp.float32).at[col, row].add(1.0)
    A = A + 2.0 * jnp.eye(n, dtype=jnp.float32)                 # improved=True
    deg = A.sum(axis=1)
    dinv = jnp.where(deg > 0.0, 1.0 / jnp.sqrt(deg), 0.0)
    A_norm = dinv[:, None] * A * dinv[None, :]
    return jnp.maximum(A_norm @ (x @ weight) + bias.reshape(1, -1), 0.0)


# ----------------------------------- main ------------------------------------ #
if __name__ == "__main__":
    key = jax.random.PRNGKey(0)
    k_x, k_w, k_b, k_x2 = jax.random.split(key, 4)

    # ---- small graph (module-scale shapes): fused single-block path ----
    num_nodes, in_channels, out_channels = 16, 8, 32
    src = jnp.arange(num_nodes, dtype=jnp.int32)
    dst = (src + 1) % num_nodes
    edge_index = jnp.concatenate(
        [jnp.stack([src, dst], axis=0), jnp.stack([dst, src], axis=0)], axis=1)

    x = jax.random.normal(k_x, (num_nodes, in_channels), dtype=jnp.float32)
    glorot = jnp.sqrt(6.0 / (in_channels + out_channels))
    weight = jax.random.uniform(k_w, (in_channels, out_channels), jnp.float32,
                                -1.0, 1.0) * glorot
    bias = 0.1 * jax.random.normal(k_b, (out_channels,), dtype=jnp.float32)

    out = jax.block_until_ready(gcn_layer_pallas(x, edge_index, weight, bias))
    ref = gcn_layer_reference(x, edge_index, weight, bias)
    assert out.shape == (num_nodes, out_channels)
    assert jnp.allclose(out, ref, atol=1e-4, rtol=1e-4), "fused path mismatch"

    # ---- larger graph: exercises the tiled streaming-aggregation path ----
    n2 = 768
    src2 = jnp.arange(n2, dtype=jnp.int32)
    edges2 = []
    for hop in (1, 3, 7):
        dst2 = (src2 + hop) % n2
        edges2.append(jnp.stack([src2, dst2], axis=0))
        edges2.append(jnp.stack([dst2, src2], axis=0))
    edge_index2 = jnp.concatenate(edges2, axis=1)
    x2 = jax.random.normal(k_x2, (n2, in_channels), dtype=jnp.float32)

    out2 = jax.block_until_ready(gcn_layer_pallas(x2, edge_index2, weight, bias))
    ref2 = gcn_layer_reference(x2, edge_index2, weight, bias)
    assert out2.shape == (n2, out_channels)
    # H is streamed in bf16 (A is exact) -> loosened tolerance for the tiled path.
    assert jnp.allclose(out2, ref2, atol=2e-2, rtol=2e-2), "tiled path mismatch"

    print("KERNEL_OK")
</pallas_src>

<mosaic_0001>
module attributes {stable_mosaic.version = 11 : i64} {
  func.func @_fused_gcn_kernel(%arg0: memref<128x128xf32, #tpu.memory_space<vmem>>, %arg1: memref<128x8xf32, #tpu.memory_space<vmem>>, %arg2: memref<8x128xf32, #tpu.memory_space<vmem>>, %arg3: memref<128x1xf32, #tpu.memory_space<vmem>>, %arg4: memref<1x128xf32, #tpu.memory_space<vmem>>, %arg5: memref<128x128xf32, #tpu.memory_space<vmem>>) attributes {dimension_semantics = [], scalar_prefetch = 0 : i64, scratch_operands = 0 : i64, tpu.core_type = #tpu.core_type<tc>} {
    %c0 = arith.constant 0 : index
    %c0_0 = arith.constant 0 : index
    %0 = vector.load %arg1[%c0, %c0_0] : memref<128x8xf32, #tpu.memory_space<vmem>>, vector<128x8xf32>
    %c0_1 = arith.constant 0 : index
    %c0_2 = arith.constant 0 : index
    %1 = vector.load %arg2[%c0_1, %c0_2] : memref<8x128xf32, #tpu.memory_space<vmem>>, vector<8x128xf32>
    %cst = arith.constant dense<0.000000e+00> : vector<128x128xf32>
    %2 = tpu.matmul %0, %1, %cst {dimension_numbers = #tpu.dot_dimension_numbers<[1], [0], [0], [1], [0, 0, 1, 1], [], []>} : vector<128x8xf32>, vector<8x128xf32>, vector<128x128xf32> -> vector<128x128xf32>
    %c0_3 = arith.constant 0 : index
    %c0_4 = arith.constant 0 : index
    %3 = vector.load %arg3[%c0_3, %c0_4] : memref<128x1xf32, #tpu.memory_space<vmem>>, vector<128x1xf32>
    %4 = vector.broadcast %3 : vector<128x1xf32> to vector<128x128xf32>
    %5 = arith.mulf %2, %4 : vector<128x128xf32>
    %c0_5 = arith.constant 0 : index
    %c0_6 = arith.constant 0 : index
    %6 = vector.load %arg0[%c0_5, %c0_6] : memref<128x128xf32, #tpu.memory_space<vmem>>, vector<128x128xf32>
    %cst_7 = arith.constant dense<0.000000e+00> : vector<128x128xf32>
    %7 = tpu.matmul %6, %5, %cst_7 {dimension_numbers = #tpu.dot_dimension_numbers<[1], [0], [0], [1], [0, 0, 1, 1], [], []>} : vector<128x128xf32>, vector<128x128xf32>, vector<128x128xf32> -> vector<128x128xf32>
    %c0_8 = arith.constant 0 : index
    %c0_9 = arith.constant 0 : index
    %8 = vector.load %arg3[%c0_8, %c0_9] : memref<128x1xf32, #tpu.memory_space<vmem>>, vector<128x1xf32>
    %9 = vector.broadcast %8 : vector<128x1xf32> to vector<128x128xf32>
    %10 = arith.mulf %7, %9 : vector<128x128xf32>
    %c0_10 = arith.constant 0 : index
    %c0_11 = arith.constant 0 : index
    %11 = vector.load %arg4[%c0_10, %c0_11] : memref<1x128xf32, #tpu.memory_space<vmem>>, vector<1x128xf32>
    %12 = vector.broadcast %11 : vector<1x128xf32> to vector<128x128xf32>
    %13 = arith.addf %10, %12 : vector<128x128xf32>
    %cst_12 = arith.constant 0.000000e+00 : f32
    %14 = vector.broadcast %cst_12 : f32 to vector<128x128xf32>
    %15 = arith.maximumf %13, %14 : vector<128x128xf32>
    %c0_13 = arith.constant 0 : index
    %c0_14 = arith.constant 0 : index
    %16 = vector.load %arg5[%c0_13, %c0_14] : memref<128x128xf32, #tpu.memory_space<vmem>>, vector<128x128xf32>
    tpu.vector_store %arg5[%c0_13, %c0_14], %15 {strides = array<i32>} : memref<128x128xf32, #tpu.memory_space<vmem>>, vector<128x128xf32>,
    return
  }
}

</mosaic_0001>

<bundles_post_ra>
// kernel: tpu_custom_call.1
= control target key start
LH: loop header
LB: loop body
LE: loop exit
PB: predicated region body
PF: predicated region fallthrough
CT: control target
= control target key end

     0   :  { %vm38_vm0 = vcmask 64512   ;;  %v818_v4 = vmov 0   ;;  %s1112_s0 = inlined_call_operand.vmem [shape: f32[128,128], index: 0, kind: input, shape index: {}]   ;;  %s1113_s1 = inlined_call_operand.vmem [shape: f32[128,8], index: 1, kind: input, shape index: {}]   ;;  %s1114_s2 = inlined_call_operand.vmem [shape: f32[8,128], index: 2, kind: input, shape index: {}]   ;;  %s1115_s3 = inlined_call_operand.vmem [shape: f32[128,1], index: 3, kind: input, shape index: {}]   ;;  %s1116_s4 = inlined_call_operand.vmem [shape: f32[1,128], index: 4, kind: input, shape index: {}]   ;;  %s1117_s5 = inlined_call_operand.hbm [shape: f32[128,128], index: 5, kind: output, shape index: {}]  }
   0x1   :  { %v37_v0 = vld [vmem:[%s1114_s2] sm:$0xff]  ;;  %v22_v2 = vld [vmem:[%s1113_s1 + $0x8] sm:$0xff]  ;;  %v23_v3 = vld [vmem:[%s1113_s1 + $0x10] sm:$0xff]  ;;  %792 = vset.pattern.permute.xlu0 %v818_v4  ;;  %793 = vset.pattern.permute.xlu1 %v818_v4 }
   0x2   :  { %v21_v1 = vld [vmem:[%s1113_s1] sm:$0xff]  ;;  %658 = vmatprep.subr.mxu0 %v37_v0  ;;  %v24_v5 = vld [vmem:[%s1113_s1 + $0x18] sm:$0xff]  ;;  %v234_v8 = vld [vmem:[%s1115_s3 + $0x10] sm:$0xff] }
   0x3   :  { %660 = vmatprep.mubr.msk.f32.mxu0 %vm38_vm0, %v21_v1  ;;  %659 = vmatpush3.msra.mxu0 %v37_v0  ;;  %v25_v6 = vld [vmem:[%s1113_s1 + $0x20] sm:$0xff]  ;;  %v233_v9 = vld [vmem:[%s1115_s3 + $0x8] sm:$0xff]  ;;  %v235_v11 = vld [vmem:[%s1115_s3 + $0x18] sm:$0xff] }
   0x4   :  { %661 = vmatmul.mubr.msk.f32.vlgmr.msra.gmra.mrb[0].mxu0 %vm38_vm0, %v22_v2  ;;  %v232_v7 = vld [vmem:[%s1115_s3] sm:$0xff]  ;;  %260 = vperm.xlu1 %793, %v234_v8   ;;  %v26_v10 = vld [vmem:[%s1113_s1 + $0x28] sm:$0xff]  ;;  %v27_v12 = vld [vmem:[%s1113_s1 + $0x30] sm:$0xff] }
   0x5   :  { %663 = vmatprep.mubr.msk.f32.mxu0 %vm38_vm0, %v23_v3  ;;  %250 = vperm.xlu0 %792, %v232_v7   ;;  %v236_v13 = vld [vmem:[%s1115_s3 + $0x20] sm:$0xff] }
   0x8   :  { %664 = vmatmul.mubr.msk.f32.gmra.mrb[2].mxu0 %vm38_vm0, %v24_v5  ;;  %265 = vperm.xlu1 %793, %v235_v11  }
   0x9   :  { %666 = vmatprep.mubr.msk.f32.mxu0 %vm38_vm0, %v25_v6  ;;  %255 = vperm.xlu0 %792, %v233_v9  }
   0xc   :  { %667 = vmatmul.mubr.msk.f32.gmra.mrb[4].mxu0 %vm38_vm0, %v26_v10 }
   0xd   :  { %10 = vsyncpa [#allocation3], 0  ;;  %669 = vmatprep.mubr.msk.f32.mxu0 %vm38_vm0, %v27_v12  ;;  %v28_v14 = vld [vmem:[%s1113_s1 + $0x38] sm:$0xff]  ;;  %v237_v15 = vld [vmem:[%s1115_s3 + $0x28] sm:$0xff]  ;;  %270 = vperm.xlu0 %792, %v236_v13  }
   0xe   :  { %v29_v16 = vld [vmem:[%s1113_s1 + $0x40] sm:$0xff]  ;;  %275 = vperm.xlu1 %793, %v237_v15   ;;  %v238_v17 = vld [vmem:[%s1115_s3 + $0x30] sm:$0xff]  ;;  %v30_v18 = vld [vmem:[%s1113_s1 + $0x48] sm:$0xff] }
   0xf   :  { %v239_v19 = vld [vmem:[%s1115_s3 + $0x38] sm:$0xff]  ;;  %v31_v20 = vld [vmem:[%s1113_s1 + $0x50] sm:$0xff]  ;;  %v240_v21 = vld [vmem:[%s1115_s3 + $0x40] sm:$0xff] }
  0x10   :  { %670 = vmatmul.mubr.msk.f32.gmra.mrb[6].mxu0 %vm38_vm0, %v28_v14  ;;  %v32_v22 = vld [vmem:[%s1113_s1 + $0x58] sm:$0xff]  ;;  %v241_v23 = vld [vmem:[%s1115_s3 + $0x48] sm:$0xff]  ;;  %v33_v24 = vld [vmem:[%s1113_s1 + $0x60] sm:$0xff] }
  0x11   :  { %672 = vmatprep.mubr.msk.f32.mxu0 %vm38_vm0, %v29_v16  ;;  %280 = vperm.xlu0 %792, %v238_v17   ;;  %v242_v25 = vld [vmem:[%s1115_s3 + $0x50] sm:$0xff]  ;;  %v34_v26 = vld [vmem:[%s1113_s1 + $0x68] sm:$0xff]  ;;  %v243_v27 = vld [vmem:[%s1115_s3 + $0x58] sm:$0xff] }
  0x12   :  { %285 = vperm.xlu1 %793, %v239_v19   ;;  %v35_v28 = vld [vmem:[%s1113_s1 + $0x70] sm:$0xff]  ;;  %v244_v29 = vld [vmem:[%s1115_s3 + $0x60] sm:$0xff]  ;;  %v36_v30 = vld [vmem:[%s1113_s1 + $0x78] sm:$0xff] }
  0x13   :  { %v245_v31 = vld [vmem:[%s1115_s3 + $0x68] sm:$0xff]  ;;  %v246_v32 = vld [vmem:[%s1115_s3 + $0x70] sm:$0xff]  ;;  %v247_v33 = vld [vmem:[%s1115_s3 + $0x78] sm:$0xff] }
  0x14   :  { %673 = vmatmul.mubr.msk.f32.gmra.mrb[8].mxu0 %vm38_vm0, %v30_v18  ;;  %v344_v34 = vld [vmem:[%s1112_s0] sm:$0xff]  ;;  %v350_v35 = vld [vmem:[%s1112_s0 + $0x30] sm:$0xff] }
  0x15   :  { %675 = vmatprep.mubr.msk.f32.mxu0 %vm38_vm0, %v31_v20  ;;  %290 = vperm.xlu0 %792, %v240_v21  }
  0x16   :  { %295 = vperm.xlu1 %793, %v241_v23   ;;  %725 = vmatprep.mubr.f32.mxu1 %v350_v35  ;;  %v354_v35 = vld [vmem:[%s1112_s0 + $0x50] sm:$0xff] }
  0x18   :  { %676 = vmatmul.mubr.msk.f32.gmra.mrb[10].mxu0 %vm38_vm0, %v32_v22 }
  0x19   :  { %678 = vmatprep.mubr.msk.f32.mxu0 %vm38_vm0, %v33_v24  ;;  %300 = vperm.xlu0 %792, %v242_v25  }
  0x1a   :  { %305 = vperm.xlu1 %793, %v243_v27  }
  0x1c   :  { %679 = vmatmul.mubr.msk.f32.gmra.mrb[12].mxu0 %vm38_vm0, %v34_v26 }
  0x1d   :  { %681 = vmatprep.mubr.msk.f32.mxu0 %vm38_vm0, %v35_v28  ;;  %310 = vperm.xlu0 %792, %v244_v29   ;;  %v345_v28 = vld [vmem:[%s1112_s0 + $0x8] sm:$0xff]  ;;  %v351_v29 = vld [vmem:[%s1112_s0 + $0x38] sm:$0xff] }
  0x1e   :  { %315 = vperm.xlu1 %793, %v245_v31   ;;  %v352_v31 = vld [vmem:[%s1112_s0 + $0x40] sm:$0xff] }
  0x20   :  { %682 = vmatmul.mubr.msk.f32.gmra.mrb[14].mxu0 %vm38_vm0, %v36_v30  ;;  %v346_v30 = vld [vmem:[%s1112_s0 + $0x10] sm:$0xff] }
  0x21   :  { %320 = vperm.xlu0 %792, %v246_v32   ;;  %716 = vmatprep.mubr.f32.mxu0 %v344_v34  ;;  %v347_v32 = vld [vmem:[%s1112_s0 + $0x18] sm:$0xff]  ;;  %v348_v34 = vld [vmem:[%s1112_s0 + $0x20] sm:$0xff] }
  0x22   :  { %325 = vperm.xlu1 %793, %v247_v33   ;;  %v353_v33 = vld [vmem:[%s1112_s0 + $0x48] sm:$0xff] }
  0x83   :  { %v973_v36 = vpop.permute.xlu1 %260 }
  0x84   :  { %v975_v37 = vpop.permute.xlu0 %250 }
  0x87   :  { %v977_v38 = vpop.permute.xlu1 %265 }
  0x88   :  { %v979_v39 = vpop.permute.xlu0 %255 }
  0x8c   :  { %v983_v41 = vpop.permute.xlu0 %270 }
  0x8d   :  { %v981_v40 = vpop.permute.xlu1 %275 }
  0x90   :  { %v989_v49 = vpop.permute.xlu0 %280 }
  0x91   :  { %v987_v46 = vpop.permute.xlu1 %285 }
  0x94   :  { %v997_v59 = vpop.permute.xlu0 %290 }
  0x95   :  { %v994_v57 = vpop.permute.xlu1 %295 }
  0x98   :  { %v1003_v4 = vpop.permute.xlu0 %300 }
  0x99   :  { %v1001_v1 = vpop.permute.xlu1 %305 }
  0x9c   :  { %v1011_v14 = vpop.permute.xlu0 %310 }
  0x9d   :  { %v1008_v12 = vpop.permute.xlu1 %315 }
  0xa0   :  { %v1017_v23 = vpop.permute.xlu0 %320 }
  0xa1   :  { %v1015_v20 = vpop.permute.xlu1 %325 }
  0xd7   :  { %v662_v42 = vpop.f32.mrb[0].mxu0 }
  0xd8   :  { %v329_v43 = vmul.f32 %v662_v42, %v979_v39  ;;  %v153_v44 = vpop.f32.mrb[1].mxu0  ;;  %v349_v42 = vld [vmem:[%s1112_s0 + $0x28] sm:$0xff] }
  0xd9   :  { %v328_v45 = vmul.f32 %v975_v37, %v153_v44  ;;  %v356_v44 = vld [vmem:[%s1112_s0 + $0x60] sm:$0xff] }
  0xdb   :  { %v740_v47 = vpack.c.bf16 %v329_v43, %v328_v45  ;;  %v665_v48 = vpop.f32.mrb[2].mxu0  ;;  %v355_v43 = vld [vmem:[%s1112_s0 + $0x58] sm:$0xff]  ;;  %v357_v45 = vld [vmem:[%s1112_s0 + $0x68] sm:$0xff] }
  0xdc   :  { %v331_v50 = vmul.f32 %v665_v48, %v977_v38  ;;  %v163_v51 = vpop.f32.mrb[3].mxu0  ;;  %v359_v48 = vld [vmem:[%s1112_s0 + $0x78] sm:$0xff] }
  0xdd   :  { %v330_v52 = vmul.f32 %v973_v36, %v163_v51  ;;  %741 = vmatprep.subr.bf16.mxu0 %v740_v47  ;;  %772 = vmatprep.subr.bf16.mxu1 %v740_v47  ;;  %v1066_v51 = vld [vmem:[%s1116_s4] ss:$0 sm:$0xff] }
  0xde   :  { %743 = vmatpush3.bf16.msra.mxu0 %v740_v47  ;;  %780 = vmatpush3.bf16.msra.mxu1 %v740_v47  ;;  %v358_v47 = vld [vmem:[%s1112_s0 + $0x70] sm:$0xff]  ;;  %s819_s0 = smov [#allocation2]  }
  0xdf   :  { %v744_v53 = vpack.c.bf16 %v331_v50, %v330_v52  ;;  %v668_v54 = vpop.f32.mrb[4].mxu0  ;;  %s581_s4 = sshll.u32 %s819_s0, 4  ;;  %s582_s4 = int_to_ptr.vmem [resolvable:$true] %s581_s4 }
  0xe0   :  { %v333_v55 = vmul.f32 %v668_v54, %v981_v40  ;;  %v173_v56 = vpop.f32.mrb[5].mxu0  ;;  %s794_s10 = scalar_lea.vmem %s582_s4, 2048  ;;  %p799_p1 = scmp.lt.s32.totalorder %s582_s4, %s582_s4 }
  0xe1   :  { %v332_v58 = vmul.f32 %v983_v41, %v173_v56  ;;  %745 = vmatprep.subr.bf16.mxu0 %v744_v53  ;;  %773 = vmatprep.subr.bf16.mxu1 %v744_v53  ;;  %p795_p0 = scmp.ne.s32.totalorder %s582_s4, %s794_s10  ;;  %p800_p2 = scmp.lt.s32.totalorder %s794_s10, %s794_s10 }
  0xe2   :  { %747 = vmatpush3.bf16.msra.mxu0 %v744_v53  ;;  %781 = vmatpush3.bf16.msra.mxu1 %v744_v53 }
  0xe3   :  { %v748_v60 = vpack.c.bf16 %v333_v55, %v332_v58  ;;  %v671_v61 = vpop.f32.mrb[6].mxu0  ;;  %p801_p3 = por %p800_p2, %p799_p1 }
  0xe4   :  { %v335_v62 = vmul.f32 %v671_v61, %v987_v46  ;;  %v183_v63 = vpop.f32.mrb[7].mxu0 }
  0xe5   :  { %v334_v0 = vmul.f32 %v989_v49, %v183_v63  ;;  %749 = vmatprep.subr.bf16.mxu0 %v748_v60  ;;  %774 = vmatprep.subr.bf16.mxu1 %v748_v60  ;;  %p802_p4 = pnand %p801_p3, %p795_p0 }
  0xe6   :  { %751 = vmatpush3.bf16.msra.mxu0 %v748_v60  ;;  %782 = vmatpush3.bf16.msra.mxu1 %v748_v60 }
  0xe7   :  { %v752_v2 = vpack.c.bf16 %v335_v62, %v334_v0  ;;  %v674_v3 = vpop.f32.mrb[8].mxu0 }
  0xe8   :  { %v337_v5 = vmul.f32 %v674_v3, %v994_v57  ;;  %v193_v6 = vpop.f32.mrb[9].mxu0 }
  0xe9   :  { %v336_v7 = vmul.f32 %v997_v59, %v193_v6  ;;  %753 = vmatprep.subr.bf16.mxu0 %v752_v2  ;;  %775 = vmatprep.subr.bf16.mxu1 %v752_v2 }
  0xea   :  { %755 = vmatpush3.bf16.msra.mxu0 %v752_v2  ;;  %783 = vmatpush3.bf16.msra.mxu1 %v752_v2 }
  0xeb   :  { %v756_v8 = vpack.c.bf16 %v337_v5, %v336_v7  ;;  %v677_v9 = vpop.f32.mrb[10].mxu0 }
  0xec   :  { %v339_v10 = vmul.f32 %v677_v9, %v1001_v1  ;;  %v203_v11 = vpop.f32.mrb[11].mxu0 }
  0xed   :  { %v338_v13 = vmul.f32 %v1003_v4, %v203_v11  ;;  %757 = vmatprep.subr.bf16.mxu0 %v756_v8  ;;  %776 = vmatprep.subr.bf16.mxu1 %v756_v8 }
  0xee   :  { %759 = vmatpush3.bf16.msra.mxu0 %v756_v8  ;;  %784 = vmatpush3.bf16.msra.mxu1 %v756_v8 }
  0xef   :  { %v760_v15 = vpack.c.bf16 %v339_v10, %v338_v13  ;;  %v680_v16 = vpop.f32.mrb[12].mxu0 }
  0xf0   :  { %v341_v17 = vmul.f32 %v680_v16, %v1008_v12  ;;  %v213_v18 = vpop.f32.mrb[13].mxu0 }
  0xf1   :  { %v340_v19 = vmul.f32 %v1011_v14, %v213_v18  ;;  %761 = vmatprep.subr.bf16.mxu0 %v760_v15  ;;  %777 = vmatprep.subr.bf16.mxu1 %v760_v15 }
  0xf2   :  { %763 = vmatpush3.bf16.msra.mxu0 %v760_v15  ;;  %785 = vmatpush3.bf16.msra.mxu1 %v760_v15 }
  0xf3   :  { %v764_v21 = vpack.c.bf16 %v341_v17, %v340_v19  ;;  %v683_v22 = vpop.f32.mrb[14].mxu0 }
  0xf4   :  { %v343_v24 = vmul.f32 %v683_v22, %v1015_v20  ;;  %v223_v25 = vpop.f32.mrb[15].mxu0 }
  0xf5   :  { %v342_v26 = vmul.f32 %v1017_v23, %v223_v25  ;;  %765 = vmatprep.subr.bf16.mxu0 %v764_v21  ;;  %778 = vmatprep.subr.bf16.mxu1 %v764_v21 }
  0xf6   :  { %767 = vmatpush3.bf16.msra.mxu0 %v764_v21  ;;  %786 = vmatpush3.bf16.msra.mxu1 %v764_v21 }
  0xf7   :  { %v768_v27 = vpack.c.bf16 %v343_v24, %v342_v26 }
  0xf9   :  { %769 = vmatprep.subr.bf16.mxu0 %v768_v27  ;;  %779 = vmatprep.subr.bf16.mxu1 %v768_v27 }
  0xfa   :  { %771 = vmatpush3.bf16.msra.mxu0 %v768_v27  ;;  %787 = vmatpush3.bf16.msra.mxu1 %v768_v27 }
  0xfd   :  { %717 = vmatmul.mubr.f32.vlgmr.msra.gmra.mrb[16].mxu0 %v345_v28  ;;  %726 = vmatmul.mubr.f32.vlgmr.msra.gmra.mrb[0].mxu1 %v351_v29 }
  0xfe   :  { %719 = vmatprep.mubr.f32.mxu0 %v346_v30  ;;  %728 = vmatprep.mubr.f32.mxu1 %v352_v31 }
 0x101   :  { %720 = vmatmul.mubr.f32.gmra.mrb[18].mxu0 %v347_v32  ;;  %729 = vmatmul.mubr.f32.gmra.mrb[2].mxu1 %v353_v33 }
 0x102   :  { %722 = vmatprep.mubr.f32.mxu0 %v348_v34  ;;  %731 = vmatprep.mubr.f32.mxu1 %v354_v35 }
 0x105   :  { %723 = vmatmul.mubr.f32.gmra.mrb[20].mxu0 %v349_v42  ;;  %732 = vmatmul.mubr.f32.gmra.mrb[4].mxu1 %v355_v43 }
 0x106   :  { %734 = vmatprep.mubr.f32.mxu1 %v356_v44 }
 0x109   :  { %735 = vmatmul.mubr.f32.gmra.mrb[6].mxu1 %v357_v45 }
 0x10a   :  { %737 = vmatprep.mubr.f32.mxu1 %v358_v47 }
 0x10d   :  { %738 = vmatmul.mubr.f32.gmra.mrb[8].mxu1 %v359_v48 }
 0x1d0   :  { %v718_v50 = vpop.f32.mrb[16].mxu0  ;;  %v727_v52 = vpop.f32.mrb[0].mxu1 }
 0x1d1   :  { %v506_v53 = vmul.f32 %v718_v50, %v979_v39  ;;  %v512_v54 = vmul.f32 %v727_v52, %v987_v46  ;;  %v426_v55 = vpop.f32.mrb[17].mxu0  ;;  %v456_v56 = vpop.f32.mrb[1].mxu1 }
 0x1d2   :  { %v505_v58 = vmul.f32 %v426_v55, %v975_v37  ;;  %v511_v60 = vmul.f32 %v456_v56, %v989_v49 }
 0x1d3   :  { %v529_v61 = vadd.f32 %v1066_v51, %v506_v53  ;;  %v535_v62 = vadd.f32 %v1066_v51, %v512_v54 }
 0x1d4   :  { %v528_v63 = vadd.f32 %v1066_v51, %v505_v58  ;;  %v534_v0 = vadd.f32 %v1066_v51, %v511_v60  ;;  %v721_v2 = vpop.f32.mrb[18].mxu0  ;;  %v730_v3 = vpop.f32.mrb[2].mxu1 }
 0x1d5   :  { %v545_v5 = vmax.f32 %v529_v61, 0.0  ;;  %v551_v39 = vmax.f32 %v535_v62, 0.0  ;;  %v508_v46 = vmul.f32 %v721_v2, %v977_v38  ;;  %v514_v6 = vmul.f32 %v730_v3, %v994_v57  ;;  %v436_v7 = vpop.f32.mrb[19].mxu0  ;;  %v466_v37 = vpop.f32.mrb[3].mxu1 }
 0x1d6   :  { %v544_v8 = vmax.f32 %v528_v63, 0.0  ;;  %v550_v49 = vmax.f32 %v534_v0, 0.0  ;;  %v507_v9 = vmul.f32 %v436_v7, %v973_v36  ;;  %v513_v10 = vmul.f32 %v466_v37, %v997_v59 }
 0x1d7   :  { %561 = vst [vmem:[#allocation2 + $0x8] sm:$0xff] %v545_v5  ;;  %567 = vst [vmem:[#allocation2 + $0x38] sm:$0xff] %v551_v39  ;;  %v531_v11 = vadd.f32 %v1066_v51, %v508_v46  ;;  %v537_v13 = vadd.f32 %v1066_v51, %v514_v6 }
 0x1d8   :  { %560 = vst [vmem:[#allocation2] sm:$0xff] %v544_v8  ;;  %566 = vst [vmem:[#allocation2 + $0x30] sm:$0xff] %v550_v49  ;;  %v530_v38 = vadd.f32 %v1066_v51, %v507_v9  ;;  %v536_v57 = vadd.f32 %v1066_v51, %v513_v10  ;;  %v724_v15 = vpop.f32.mrb[20].mxu0  ;;  %v733_v16 = vpop.f32.mrb[4].mxu1 }
 0x1d9   :  { %v547_v17 = vmax.f32 %v531_v11, 0.0  ;;  %v553_v18 = vmax.f32 %v537_v13, 0.0  ;;  %v510_v36 = vmul.f32 %v724_v15, %v981_v40  ;;  %v516_v59 = vmul.f32 %v733_v16, %v1001_v1  ;;  %v446_v19 = vpop.f32.mrb[21].mxu0  ;;  %v476_v21 = vpop.f32.mrb[5].mxu1 }
 0x1da   :  { %v546_v22 = vmax.f32 %v530_v38, 0.0  ;;  %v552_v24 = vmax.f32 %v536_v57, 0.0  ;;  %v509_v25 = vmul.f32 %v446_v19, %v983_v41  ;;  %v515_v26 = vmul.f32 %v476_v21, %v1003_v4 }
 0x1db   :  { %563 = vst [vmem:[#allocation2 + $0x18] sm:$0xff] %v547_v17  ;;  %569 = vst [vmem:[#allocation2 + $0x48] sm:$0xff] %v553_v18  ;;  %v533_v27 = vadd.f32 %v1066_v51, %v510_v36  ;;  %v539_v28 = vadd.f32 %v1066_v51, %v516_v59 }
 0x1dc   :  { %562 = vst [vmem:[#allocation2 + $0x10] sm:$0xff] %v546_v22  ;;  %568 = vst [vmem:[#allocation2 + $0x40] sm:$0xff] %v552_v24  ;;  %v532_v40 = vadd.f32 %v1066_v51, %v509_v25  ;;  %v538_v1 = vadd.f32 %v1066_v51, %v515_v26  ;;  %v736_v29 = vpop.f32.mrb[6].mxu1 }
 0x1dd   :  { %v549_v30 = vmax.f32 %v533_v27, 0.0  ;;  %v555_v31 = vmax.f32 %v539_v28, 0.0  ;;  %v518_v32 = vmul.f32 %v736_v29, %v1008_v12  ;;  %v486_v41 = vpop.f32.mrb[7].mxu1 }
 0x1de   :  { %v548_v33 = vmax.f32 %v532_v40, 0.0  ;;  %v554_v4 = vmax.f32 %v538_v1, 0.0  ;;  %v517_v34 = vmul.f32 %v486_v41, %v1011_v14 }
 0x1df   :  { %565 = vst [vmem:[#allocation2 + $0x28] sm:$0xff] %v549_v30  ;;  %571 = vst [vmem:[#allocation2 + $0x58] sm:$0xff] %v555_v31  ;;  %v541_v35 = vadd.f32 %v1066_v51, %v518_v32 }
 0x1e0   :  { %564 = vst [vmem:[#allocation2 + $0x20] sm:$0xff] %v548_v33  ;;  %570 = vst [vmem:[#allocation2 + $0x50] sm:$0xff] %v554_v4  ;;  %v540_v42 = vadd.f32 %v1066_v51, %v517_v34  ;;  %v739_v43 = vpop.f32.mrb[8].mxu1 }
 0x1e1   :  { %v557_v44 = vmax.f32 %v541_v35, 0.0  ;;  %v520_v45 = vmul.f32 %v739_v43, %v1015_v20  ;;  %v496_v47 = vpop.f32.mrb[9].mxu1 }
 0x1e2   :  { %v556_v48 = vmax.f32 %v540_v42, 0.0  ;;  %v519_v12 = vmul.f32 %v496_v47, %v1017_v23 }
 0x1e3   :  { %573 = vst [vmem:[#allocation2 + $0x68] sm:$0xff] %v557_v44  ;;  %v543_v14 = vadd.f32 %v1066_v51, %v520_v45 }
 0x1e4   :  { %572 = vst [vmem:[#allocation2 + $0x60] sm:$0xff] %v556_v48  ;;  %v542_v50 = vadd.f32 %v1066_v51, %v519_v12 }
 0x1e5   :  { %v559_v52 = vmax.f32 %v543_v14, 0.0 }
 0x1e6   :  { %v558_v53 = vmax.f32 %v542_v50, 0.0 }
 0x1e7   :  { %575 = vst [vmem:[#allocation2 + $0x78] sm:$0xff] %v559_v52 }
 0x1e8   :  { %574 = vst [vmem:[#allocation2 + $0x70] sm:$0xff] %v558_v53 }
 0x1e9   :  { %805 = shalt.err (!%p802_p4)
}
 0x1ea   :  { %s806_s13 = scalar_lea.hbm %s1117_s5, 2048 }
 0x1eb   :  { %p807_p5 = scmp.ne.s32.totalorder %s1117_s5, %s806_s13  ;;  %p810_p6 = scmp.lt.u32.totalorder %s806_s13, %s1117_s5 }
 0x1ed   :  { %p812_p7 = pnand %p810_p6, %p807_p5 }
 0x1ef   :  { %815 = shalt.err (!%p812_p7)
}
 0x1f0   :  { %s820_s18 = smov 128   ;;  %s821_s19 = smov 8  }
 0x1f1   :  { %587 = dma.vmem_to_hbm [thread:$0]  %s582_s4, 2048, %s1117_s5, [#allocation3], %s820_s18, %s820_s18, %s821_s19  }
 0x1f2   :  { %816 = dma.done.wait [#allocation3], 2048  }
 0x1f3   :  { %817 = vsyncadd [#allocation3], 4294965248 }
 0x1f4   :  { %591 = vsyncpa [#allocation3], 1 }

</bundles_post_ra>
